<compile_context>
chip_gen: v6e
topology: v6e:2x2x1
jax: 0.10.0
libtpu: 0.0.40
codegen_flags: <defaults>
</compile_context>

<pallas_src>
import jax
import jax.numpy as jnp
from jax.experimental import pallas as pl
from jax.experimental.pallas import tpu as pltpu


def lstm_kernel(x_ref, slab_ref, whh_ref, out_ref):
    T = x_ref.shape[0]
    H = whh_ref.shape[0]

    w_ih_row = slab_ref[0:1, :]        # (1, 4H)
    bias = slab_ref[1:2, :]            # (1, 4H)  (b_ih + b_hh, pre-summed on host)
    w_lin = slab_ref[2:3, :H]          # (1, H)
    b_lin = slab_ref[3:4, 0:1]         # (1, 1)

    # Input projection on the VPU: inputSize == 1, so (T,1) * (1,4H) is a single
    # broadcast multiply -- no K=1 MXU round-trip -- plus one bias add.
    xw = x_ref[...] * w_ih_row + bias  # (T, 4H)

    # ---- step t = 0 peeled: h = c = 0, so gates = xw[0] and c = i*g --------------
    g0 = xw[0:1, :]
    sig0 = jax.nn.sigmoid(g0)                           # i, f, _, o lanes
    i0 = sig0[:, 0 * H:1 * H]
    gg0 = jnp.tanh(g0[:, 2 * H:3 * H])
    o0 = sig0[:, 3 * H:4 * H]
    c = i0 * gg0
    h = o0 * jnp.tanh(c)

    # ---- steps t = 1 .. T-1 ------------------------------------------------------
    # The recurrence is serially dependent (h_{t} feeds the next matmul); the static
    # unroll over T only removes loop overhead and gives the scheduler full visibility.
    for t in range(1, T):
        gates = xw[t:t + 1, :] + jnp.dot(
            h, whh_ref[...], preferred_element_type=jnp.float32)   # (1, 4H)

        # Two full-vreg EUP passes (sigmoid over all gate lanes, tanh over g lanes).
        sig = jax.nn.sigmoid(gates)
        g = jnp.tanh(gates[:, 2 * H:3 * H])
        i = sig[:, 0 * H:1 * H]
        f = sig[:, 1 * H:2 * H]
        o = sig[:, 3 * H:4 * H]

        c = f * c + i * g
        h = o * jnp.tanh(c)

    # Final linear (outputSize = 1), fused into the last-step epilogue and kept on
    # the VPU/XLU: multiply + lane reduce, no extra MXU round-trip.
    out_ref[...] = jnp.sum(h * w_lin, axis=-1, keepdims=True) + b_lin


def pack_params(w_ih_t, w_hh_t, b_ih, b_hh, w_lin, b_lin):
    """Pack the five tiny parameter arrays into one (8, 4H) f32 slab (single DMA)."""
    H = w_hh_t.shape[0]
    assert w_ih_t.shape[0] == 1 and w_lin.shape[0] == 1  # inputSize = outputSize = 1
    slab = jnp.zeros((8, 4 * H), jnp.float32)
    slab = slab.at[0, :].set(w_ih_t[0])
    slab = slab.at[1, :].set(b_ih[0] + b_hh[0])
    slab = slab.at[2, :H].set(w_lin[0])
    slab = slab.at[3, 0].set(b_lin[0, 0])
    return slab


def lstm_forward(x, slab, w_hh_t):
    vmem = pl.BlockSpec(memory_space=pltpu.MemorySpace.VMEM)
    out = pl.pallas_call(
        lstm_kernel,
        out_shape=jax.ShapeDtypeStruct((1, 1), jnp.float32),
        in_specs=[vmem, vmem, vmem],
        out_specs=vmem,
    )(x, slab, w_hh_t)
    return out[0]   # (outputSize,) == predictions[-1]


def lstm_reference(x, w_ih_t, w_hh_t, b_ih, b_hh, w_lin, b_lin):
    """Pure-JAX reference matching torch.nn.LSTM + Linear semantics."""
    H = w_hh_t.shape[0]
    h = jnp.zeros((1, H), jnp.float32)
    c = jnp.zeros((1, H), jnp.float32)
    for t in range(x.shape[0]):
        gates = x[t:t + 1] @ w_ih_t + h @ w_hh_t + b_ih + b_hh
        i = jax.nn.sigmoid(gates[:, 0 * H:1 * H])
        f = jax.nn.sigmoid(gates[:, 1 * H:2 * H])
        g = jnp.tanh(gates[:, 2 * H:3 * H])
        o = jax.nn.sigmoid(gates[:, 3 * H:4 * H])
        c = f * c + i * g
        h = o * jnp.tanh(c)
    return (h @ w_lin.T + b_lin)[0]


if __name__ == "__main__":
    input_size = 1
    hidden_size = 32
    output_size = 1
    seq_len = 8

    key = jax.random.PRNGKey(0)
    ks = jax.random.split(key, 8)
    bound = 1.0 / jnp.sqrt(hidden_size)

    def uni(k, shape):
        return jax.random.uniform(k, shape, jnp.float32, -bound, bound)

    # Parameters (stored pre-transposed for row-vector matmuls in the kernel).
    w_ih_t = uni(ks[0], (input_size, 4 * hidden_size))   # = W_ih.T
    w_hh_t = uni(ks[1], (hidden_size, 4 * hidden_size))  # = W_hh.T
    b_ih = uni(ks[2], (1, 4 * hidden_size))
    b_hh = uni(ks[3], (1, 4 * hidden_size))
    w_lin = uni(ks[4], (output_size, hidden_size))       # = linear.weight, (1, H)
    b_lin = uni(ks[5], (1, output_size))

    # Input sequence (equivalent to inputSeq of length seq_len, inputSize=1).
    x = jax.random.normal(ks[6], (seq_len, input_size), jnp.float32)

    slab = pack_params(w_ih_t, w_hh_t, b_ih, b_hh, w_lin, b_lin)

    pred = lstm_forward(x, slab, w_hh_t)
    jax.block_until_ready(pred)

    ref = lstm_reference(x, w_ih_t, w_hh_t, b_ih, b_hh, w_lin, b_lin)
    assert pred.shape == (output_size,)
    assert jnp.allclose(pred, ref, atol=1e-5, rtol=1e-5)

    print("KERNEL_OK")
</pallas_src>

<mosaic_0001>
module attributes {stable_mosaic.version = 11 : i64} {
  func.func @lstm_kernel(%arg0: memref<8x1xf32, #tpu.memory_space<vmem>>, %arg1: memref<8x128xf32, #tpu.memory_space<vmem>>, %arg2: memref<32x128xf32, #tpu.memory_space<vmem>>, %arg3: memref<1x1xf32, #tpu.memory_space<vmem>>) attributes {dimension_semantics = [], scalar_prefetch = 0 : i64, scratch_operands = 0 : i64, tpu.core_type = #tpu.core_type<tc>} {
    %c0 = arith.constant 0 : index
    %c0_0 = arith.constant 0 : index
    %0 = vector.load %arg1[%c0, %c0_0] : memref<8x128xf32, #tpu.memory_space<vmem>>, vector<1x128xf32>
    %c1 = arith.constant 1 : index
    %c0_1 = arith.constant 0 : index
    %1 = vector.load %arg1[%c1, %c0_1] : memref<8x128xf32, #tpu.memory_space<vmem>>, vector<1x128xf32>
    %c2 = arith.constant 2 : index
    %c0_2 = arith.constant 0 : index
    %2 = vector.load %arg1[%c2, %c0_2] : memref<8x128xf32, #tpu.memory_space<vmem>>, vector<1x32xf32>
    %c3 = arith.constant 3 : index
    %c0_3 = arith.constant 0 : index
    %3 = vector.load %arg1[%c3, %c0_3] : memref<8x128xf32, #tpu.memory_space<vmem>>, vector<1x1xf32>
    %c0_4 = arith.constant 0 : index
    %c0_5 = arith.constant 0 : index
    %4 = vector.load %arg0[%c0_4, %c0_5] : memref<8x1xf32, #tpu.memory_space<vmem>>, vector<8x1xf32>
    %5 = vector.broadcast %4 : vector<8x1xf32> to vector<8x128xf32>
    %6 = vector.broadcast %0 : vector<1x128xf32> to vector<8x128xf32>
    %7 = arith.mulf %5, %6 : vector<8x128xf32>
    %8 = vector.broadcast %1 : vector<1x128xf32> to vector<8x128xf32>
    %9 = arith.addf %7, %8 : vector<8x128xf32>
    %10 = vector.extract_strided_slice %9 {offsets = [0, 0], sizes = [1, 128], strides = [1, 1]} : vector<8x128xf32> to vector<1x128xf32>
    %11 = arith.negf %10 : vector<1x128xf32>
    %12 = math.exp %11 : vector<1x128xf32>
    %cst = arith.constant 1.000000e+00 : f32
    %13 = vector.broadcast %cst : f32 to vector<1x128xf32>
    %14 = arith.addf %13, %12 : vector<1x128xf32>
    %15 = arith.divf %13, %14 : vector<1x128xf32>
    %16 = vector.extract_strided_slice %15 {offsets = [0, 0], sizes = [1, 32], strides = [1, 1]} : vector<1x128xf32> to vector<1x32xf32>
    %17 = vector.extract_strided_slice %10 {offsets = [0, 64], sizes = [1, 32], strides = [1, 1]} : vector<1x128xf32> to vector<1x32xf32>
    %18 = math.tanh %17 : vector<1x32xf32>
    %19 = vector.extract_strided_slice %15 {offsets = [0, 96], sizes = [1, 32], strides = [1, 1]} : vector<1x128xf32> to vector<1x32xf32>
    %20 = arith.mulf %16, %18 : vector<1x32xf32>
    %21 = math.tanh %20 : vector<1x32xf32>
    %22 = arith.mulf %19, %21 : vector<1x32xf32>
    %23 = vector.extract_strided_slice %9 {offsets = [1, 0], sizes = [1, 128], strides = [1, 1]} : vector<8x128xf32> to vector<1x128xf32>
    %c0_6 = arith.constant 0 : index
    %c0_7 = arith.constant 0 : index
    %24 = vector.load %arg2[%c0_6, %c0_7] : memref<32x128xf32, #tpu.memory_space<vmem>>, vector<32x128xf32>
    %cst_8 = arith.constant dense<0.000000e+00> : vector<1x128xf32>
    %25 = tpu.matmul %22, %24, %cst_8 {dimension_numbers = #tpu.dot_dimension_numbers<[1], [0], [0], [1], [0, 0, 1, 1], [], []>} : vector<1x32xf32>, vector<32x128xf32>, vector<1x128xf32> -> vector<1x128xf32>
    %26 = arith.addf %23, %25 : vector<1x128xf32>
    %27 = arith.negf %26 : vector<1x128xf32>
    %28 = math.exp %27 : vector<1x128xf32>
    %cst_9 = arith.constant 1.000000e+00 : f32
    %29 = vector.broadcast %cst_9 : f32 to vector<1x128xf32>
    %30 = arith.addf %29, %28 : vector<1x128xf32>
    %31 = arith.divf %29, %30 : vector<1x128xf32>
    %32 = vector.extract_strided_slice %26 {offsets = [0, 64], sizes = [1, 32], strides = [1, 1]} : vector<1x128xf32> to vector<1x32xf32>
    %33 = math.tanh %32 : vector<1x32xf32>
    %34 = vector.extract_strided_slice %31 {offsets = [0, 0], sizes = [1, 32], strides = [1, 1]} : vector<1x128xf32> to vector<1x32xf32>
    %35 = vector.extract_strided_slice %31 {offsets = [0, 32], sizes = [1, 32], strides = [1, 1]} : vector<1x128xf32> to vector<1x32xf32>
    %36 = vector.extract_strided_slice %31 {offsets = [0, 96], sizes = [1, 32], strides = [1, 1]} : vector<1x128xf32> to vector<1x32xf32>
    %37 = arith.mulf %35, %20 : vector<1x32xf32>
    %38 = arith.mulf %34, %33 : vector<1x32xf32>
    %39 = arith.addf %37, %38 : vector<1x32xf32>
    %40 = math.tanh %39 : vector<1x32xf32>
    %41 = arith.mulf %36, %40 : vector<1x32xf32>
    %42 = vector.extract_strided_slice %9 {offsets = [2, 0], sizes = [1, 128], strides = [1, 1]} : vector<8x128xf32> to vector<1x128xf32>
    %c0_10 = arith.constant 0 : index
    %c0_11 = arith.constant 0 : index
    %43 = vector.load %arg2[%c0_10, %c0_11] : memref<32x128xf32, #tpu.memory_space<vmem>>, vector<32x128xf32>
    %cst_12 = arith.constant dense<0.000000e+00> : vector<1x128xf32>
    %44 = tpu.matmul %41, %43, %cst_12 {dimension_numbers = #tpu.dot_dimension_numbers<[1], [0], [0], [1], [0, 0, 1, 1], [], []>} : vector<1x32xf32>, vector<32x128xf32>, vector<1x128xf32> -> vector<1x128xf32>
    %45 = arith.addf %42, %44 : vector<1x128xf32>
    %46 = arith.negf %45 : vector<1x128xf32>
    %47 = math.exp %46 : vector<1x128xf32>
    %cst_13 = arith.constant 1.000000e+00 : f32
    %48 = vector.broadcast %cst_13 : f32 to vector<1x128xf32>
    %49 = arith.addf %48, %47 : vector<1x128xf32>
    %50 = arith.divf %48, %49 : vector<1x128xf32>
    %51 = vector.extract_strided_slice %45 {offsets = [0, 64], sizes = [1, 32], strides = [1, 1]} : vector<1x128xf32> to vector<1x32xf32>
    %52 = math.tanh %51 : vector<1x32xf32>
    %53 = vector.extract_strided_slice %50 {offsets = [0, 0], sizes = [1, 32], strides = [1, 1]} : vector<1x128xf32> to vector<1x32xf32>
    %54 = vector.extract_strided_slice %50 {offsets = [0, 32], sizes = [1, 32], strides = [1, 1]} : vector<1x128xf32> to vector<1x32xf32>
    %55 = vector.extract_strided_slice %50 {offsets = [0, 96], sizes = [1, 32], strides = [1, 1]} : vector<1x128xf32> to vector<1x32xf32>
    %56 = arith.mulf %54, %39 : vector<1x32xf32>
    %57 = arith.mulf %53, %52 : vector<1x32xf32>
    %58 = arith.addf %56, %57 : vector<1x32xf32>
    %59 = math.tanh %58 : vector<1x32xf32>
    %60 = arith.mulf %55, %59 : vector<1x32xf32>
    %61 = vector.extract_strided_slice %9 {offsets = [3, 0], sizes = [1, 128], strides = [1, 1]} : vector<8x128xf32> to vector<1x128xf32>
    %c0_14 = arith.constant 0 : index
    %c0_15 = arith.constant 0 : index
    %62 = vector.load %arg2[%c0_14, %c0_15] : memref<32x128xf32, #tpu.memory_space<vmem>>, vector<32x128xf32>
    %cst_16 = arith.constant dense<0.000000e+00> : vector<1x128xf32>
    %63 = tpu.matmul %60, %62, %cst_16 {dimension_numbers = #tpu.dot_dimension_numbers<[1], [0], [0], [1], [0, 0, 1, 1], [], []>} : vector<1x32xf32>, vector<32x128xf32>, vector<1x128xf32> -> vector<1x128xf32>
    %64 = arith.addf %61, %63 : vector<1x128xf32>
    %65 = arith.negf %64 : vector<1x128xf32>
    %66 = math.exp %65 : vector<1x128xf32>
    %cst_17 = arith.constant 1.000000e+00 : f32
    %67 = vector.broadcast %cst_17 : f32 to vector<1x128xf32>
    %68 = arith.addf %67, %66 : vector<1x128xf32>
    %69 = arith.divf %67, %68 : vector<1x128xf32>
    %70 = vector.extract_strided_slice %64 {offsets = [0, 64], sizes = [1, 32], strides = [1, 1]} : vector<1x128xf32> to vector<1x32xf32>
    %71 = math.tanh %70 : vector<1x32xf32>
    %72 = vector.extract_strided_slice %69 {offsets = [0, 0], sizes = [1, 32], strides = [1, 1]} : vector<1x128xf32> to vector<1x32xf32>
    %73 = vector.extract_strided_slice %69 {offsets = [0, 32], sizes = [1, 32], strides = [1, 1]} : vector<1x128xf32> to vector<1x32xf32>
    %74 = vector.extract_strided_slice %69 {offsets = [0, 96], sizes = [1, 32], strides = [1, 1]} : vector<1x128xf32> to vector<1x32xf32>
    %75 = arith.mulf %73, %58 : vector<1x32xf32>
    %76 = arith.mulf %72, %71 : vector<1x32xf32>
    %77 = arith.addf %75, %76 : vector<1x32xf32>
    %78 = math.tanh %77 : vector<1x32xf32>
    %79 = arith.mulf %74, %78 : vector<1x32xf32>
    %80 = vector.extract_strided_slice %9 {offsets = [4, 0], sizes = [1, 128], strides = [1, 1]} : vector<8x128xf32> to vector<1x128xf32>
    %c0_18 = arith.constant 0 : index
    %c0_19 = arith.constant 0 : index
    %81 = vector.load %arg2[%c0_18, %c0_19] : memref<32x128xf32, #tpu.memory_space<vmem>>, vector<32x128xf32>
    %cst_20 = arith.constant dense<0.000000e+00> : vector<1x128xf32>
    %82 = tpu.matmul %79, %81, %cst_20 {dimension_numbers = #tpu.dot_dimension_numbers<[1], [0], [0], [1], [0, 0, 1, 1], [], []>} : vector<1x32xf32>, vector<32x128xf32>, vector<1x128xf32> -> vector<1x128xf32>
    %83 = arith.addf %80, %82 : vector<1x128xf32>
    %84 = arith.negf %83 : vector<1x128xf32>
    %85 = math.exp %84 : vector<1x128xf32>
    %cst_21 = arith.constant 1.000000e+00 : f32
    %86 = vector.broadcast %cst_21 : f32 to vector<1x128xf32>
    %87 = arith.addf %86, %85 : vector<1x128xf32>
    %88 = arith.divf %86, %87 : vector<1x128xf32>
    %89 = vector.extract_strided_slice %83 {offsets = [0, 64], sizes = [1, 32], strides = [1, 1]} : vector<1x128xf32> to vector<1x32xf32>
    %90 = math.tanh %89 : vector<1x32xf32>
    %91 = vector.extract_strided_slice %88 {offsets = [0, 0], sizes = [1, 32], strides = [1, 1]} : vector<1x128xf32> to vector<1x32xf32>
    %92 = vector.extract_strided_slice %88 {offsets = [0, 32], sizes = [1, 32], strides = [1, 1]} : vector<1x128xf32> to vector<1x32xf32>
    %93 = vector.extract_strided_slice %88 {offsets = [0, 96], sizes = [1, 32], strides = [1, 1]} : vector<1x128xf32> to vector<1x32xf32>
    %94 = arith.mulf %92, %77 : vector<1x32xf32>
    %95 = arith.mulf %91, %90 : vector<1x32xf32>
    %96 = arith.addf %94, %95 : vector<1x32xf32>
    %97 = math.tanh %96 : vector<1x32xf32>
    %98 = arith.mulf %93, %97 : vector<1x32xf32>
    %99 = vector.extract_strided_slice %9 {offsets = [5, 0], sizes = [1, 128], strides = [1, 1]} : vector<8x128xf32> to vector<1x128xf32>
    %c0_22 = arith.constant 0 : index
    %c0_23 = arith.constant 0 : index
    %100 = vector.load %arg2[%c0_22, %c0_23] : memref<32x128xf32, #tpu.memory_space<vmem>>, vector<32x128xf32>
    %cst_24 = arith.constant dense<0.000000e+00> : vector<1x128xf32>
    %101 = tpu.matmul %98, %100, %cst_24 {dimension_numbers = #tpu.dot_dimension_numbers<[1], [0], [0], [1], [0, 0, 1, 1], [], []>} : vector<1x32xf32>, vector<32x128xf32>, vector<1x128xf32> -> vector<1x128xf32>
    %102 = arith.addf %99, %101 : vector<1x128xf32>
    %103 = arith.negf %102 : vector<1x128xf32>
    %104 = math.exp %103 : vector<1x128xf32>
    %cst_25 = arith.constant 1.000000e+00 : f32
    %105 = vector.broadcast %cst_25 : f32 to vector<1x128xf32>
    %106 = arith.addf %105, %104 : vector<1x128xf32>
    %107 = arith.divf %105, %106 : vector<1x128xf32>
    %108 = vector.extract_strided_slice %102 {offsets = [0, 64], sizes = [1, 32], strides = [1, 1]} : vector<1x128xf32> to vector<1x32xf32>
    %109 = math.tanh %108 : vector<1x32xf32>
    %110 = vector.extract_strided_slice %107 {offsets = [0, 0], sizes = [1, 32], strides = [1, 1]} : vector<1x128xf32> to vector<1x32xf32>
    %111 = vector.extract_strided_slice %107 {offsets = [0, 32], sizes = [1, 32], strides = [1, 1]} : vector<1x128xf32> to vector<1x32xf32>
    %112 = vector.extract_strided_slice %107 {offsets = [0, 96], sizes = [1, 32], strides = [1, 1]} : vector<1x128xf32> to vector<1x32xf32>
    %113 = arith.mulf %111, %96 : vector<1x32xf32>
    %114 = arith.mulf %110, %109 : vector<1x32xf32>
    %115 = arith.addf %113, %114 : vector<1x32xf32>
    %116 = math.tanh %115 : vector<1x32xf32>
    %117 = arith.mulf %112, %116 : vector<1x32xf32>
    %118 = vector.extract_strided_slice %9 {offsets = [6, 0], sizes = [1, 128], strides = [1, 1]} : vector<8x128xf32> to vector<1x128xf32>
    %c0_26 = arith.constant 0 : index
    %c0_27 = arith.constant 0 : index
    %119 = vector.load %arg2[%c0_26, %c0_27] : memref<32x128xf32, #tpu.memory_space<vmem>>, vector<32x128xf32>
    %cst_28 = arith.constant dense<0.000000e+00> : vector<1x128xf32>
    %120 = tpu.matmul %117, %119, %cst_28 {dimension_numbers = #tpu.dot_dimension_numbers<[1], [0], [0], [1], [0, 0, 1, 1], [], []>} : vector<1x32xf32>, vector<32x128xf32>, vector<1x128xf32> -> vector<1x128xf32>
    %121 = arith.addf %118, %120 : vector<1x128xf32>
    %122 = arith.negf %121 : vector<1x128xf32>
    %123 = math.exp %122 : vector<1x128xf32>
    %cst_29 = arith.constant 1.000000e+00 : f32
    %124 = vector.broadcast %cst_29 : f32 to vector<1x128xf32>
    %125 = arith.addf %124, %123 : vector<1x128xf32>
    %126 = arith.divf %124, %125 : vector<1x128xf32>
    %127 = vector.extract_strided_slice %121 {offsets = [0, 64], sizes = [1, 32], strides = [1, 1]} : vector<1x128xf32> to vector<1x32xf32>
    %128 = math.tanh %127 : vector<1x32xf32>
    %129 = vector.extract_strided_slice %126 {offsets = [0, 0], sizes = [1, 32], strides = [1, 1]} : vector<1x128xf32> to vector<1x32xf32>
    %130 = vector.extract_strided_slice %126 {offsets = [0, 32], sizes = [1, 32], strides = [1, 1]} : vector<1x128xf32> to vector<1x32xf32>
    %131 = vector.extract_strided_slice %126 {offsets = [0, 96], sizes = [1, 32], strides = [1, 1]} : vector<1x128xf32> to vector<1x32xf32>
    %132 = arith.mulf %130, %115 : vector<1x32xf32>
    %133 = arith.mulf %129, %128 : vector<1x32xf32>
    %134 = arith.addf %132, %133 : vector<1x32xf32>
    %135 = math.tanh %134 : vector<1x32xf32>
    %136 = arith.mulf %131, %135 : vector<1x32xf32>
    %137 = vector.extract_strided_slice %9 {offsets = [7, 0], sizes = [1, 128], strides = [1, 1]} : vector<8x128xf32> to vector<1x128xf32>
    %c0_30 = arith.constant 0 : index
    %c0_31 = arith.constant 0 : index
    %138 = vector.load %arg2[%c0_30, %c0_31] : memref<32x128xf32, #tpu.memory_space<vmem>>, vector<32x128xf32>
    %cst_32 = arith.constant dense<0.000000e+00> : vector<1x128xf32>
    %139 = tpu.matmul %136, %138, %cst_32 {dimension_numbers = #tpu.dot_dimension_numbers<[1], [0], [0], [1], [0, 0, 1, 1], [], []>} : vector<1x32xf32>, vector<32x128xf32>, vector<1x128xf32> -> vector<1x128xf32>
    %140 = arith.addf %137, %139 : vector<1x128xf32>
    %141 = arith.negf %140 : vector<1x128xf32>
    %142 = math.exp %141 : vector<1x128xf32>
    %cst_33 = arith.constant 1.000000e+00 : f32
    %143 = vector.broadcast %cst_33 : f32 to vector<1x128xf32>
    %144 = arith.addf %143, %142 : vector<1x128xf32>
    %145 = arith.divf %143, %144 : vector<1x128xf32>
    %146 = vector.extract_strided_slice %140 {offsets = [0, 64], sizes = [1, 32], strides = [1, 1]} : vector<1x128xf32> to vector<1x32xf32>
    %147 = math.tanh %146 : vector<1x32xf32>
    %148 = vector.extract_strided_slice %145 {offsets = [0, 0], sizes = [1, 32], strides = [1, 1]} : vector<1x128xf32> to vector<1x32xf32>
    %149 = vector.extract_strided_slice %145 {offsets = [0, 32], sizes = [1, 32], strides = [1, 1]} : vector<1x128xf32> to vector<1x32xf32>
    %150 = vector.extract_strided_slice %145 {offsets = [0, 96], sizes = [1, 32], strides = [1, 1]} : vector<1x128xf32> to vector<1x32xf32>
    %151 = arith.mulf %149, %134 : vector<1x32xf32>
    %152 = arith.mulf %148, %147 : vector<1x32xf32>
    %153 = arith.addf %151, %152 : vector<1x32xf32>
    %154 = math.tanh %153 : vector<1x32xf32>
    %155 = arith.mulf %150, %154 : vector<1x32xf32>
    %156 = arith.mulf %155, %2 : vector<1x32xf32>
    %cst_34 = arith.constant dense<0.000000e+00> : vector<1xf32>
    %157 = vector.multi_reduction <add>, %156, %cst_34 [1] : vector<1x32xf32> to vector<1xf32>
    %158 = vector.shape_cast %157 : vector<1xf32> to vector<1x1xf32>
    %159 = arith.addf %158, %3 : vector<1x1xf32>
    %c0_35 = arith.constant 0 : index
    %c0_36 = arith.constant 0 : index
    %160 = vector.load %arg3[%c0_35, %c0_36] : memref<1x1xf32, #tpu.memory_space<vmem>>, vector<1x1xf32>
    tpu.vector_store %arg3[%c0_35, %c0_36], %159 {strides = array<i32>} : memref<1x1xf32, #tpu.memory_space<vmem>>, vector<1x1xf32>,
    return
  }
}

</mosaic_0001>

<bundles_post_ra>
// kernel: tpu_custom_call.1
= control target key start
LH: loop header
LB: loop body
LE: loop exit
PB: predicated region body
PF: predicated region fallthrough
CT: control target
= control target key end

     0   :  { %8 = vsyncpa [#allocation3], 0  ;;  %s1285_s0 = inlined_call_operand.vmem [shape: f32[8,1], index: 0, kind: input, shape index: {}]   ;;  %s1286_s1 = inlined_call_operand.vmem [shape: f32[8,128], index: 1, kind: input, shape index: {}]   ;;  %s1287_s2 = inlined_call_operand.hbm [shape: f32[32,128], index: 2, kind: input, shape index: {}]   ;;  %s1288_s3 = inlined_call_operand.hbm [shape: f32[1,1], index: 3, kind: output, shape index: {}]  }
   0x1   :  { %9 = vsyncpa [#allocation4], 0  ;;  %s1105_s12 = smov [#allocation2]  }
   0x2   :  { %s19_s13 = sshll.u32 %s1105_s12, 4  ;;  %s20_s13 = int_to_ptr.vmem [resolvable:$true] %s19_s13 }
   0x3   :  { %s1069_s14 = scalar_lea.vmem %s20_s13, 512  ;;  %p1074_p1 = scmp.lt.s32.totalorder %s20_s13, %s20_s13 }
   0x4   :  { %p1070_p0 = scmp.ne.s32.totalorder %s20_s13, %s1069_s14  ;;  %p1075_p2 = scmp.lt.s32.totalorder %s1069_s14, %s1069_s14 }
   0x6   :  { %p1076_p3 = por %p1075_p2, %p1074_p1 }
   0x8   :  { %p1077_p4 = pnand %p1076_p3, %p1070_p0 }
   0xa   :  { %1080 = shalt.err (!%p1077_p4)
}
   0xb   :  { %s1106_s15 = smov 128   ;;  %s1107_s16 = smov 8  }
   0xc   :  { %25 = dma.hbm_to_vmem [thread:$0]  %s1287_s2, 512, %s20_s13, [#allocation3], %s1106_s15, %s1106_s15, %s1107_s16  }
   0xd   :  { %1101 = dma.done.wait [#allocation3], 512  }
   0xe   :  { %1102 = vsyncadd [#allocation3], 4294966784  ;;  %v1108_v0 = vmov 0   ;;  %v33_v1 = vld [vmem:[%s1285_s0] sm:$0xff]  ;;  %s1109_s2 = smov 64   ;;  %v1152_v14 = vld [vmem:[#allocation2 + $0x18] sm:$0xff] }
   0xf   :  { %996 = vset.pattern.permute.xlu0 %v1108_v0  ;;  %v857_v2 = vld [vmem:[%s1286_s1] ss:$0 sm:$0xff]  ;;  %v858_v4 = vld [vmem:[%s1286_s1 + $0x1] ss:$0 sm:$0xff]  ;;  %v1110_v15 = vmov 0.0   ;;  %v1155_v16 = vld [vmem:[#allocation2 + $0x10] sm:$0xff] }
  0x10   :  { %36 = vperm.xlu0 %996, %v33_v1   ;;  %909 = vmatprep.subr.mxu0 %v1110_v15  ;;  %vm1111_vm0 = vmmov 0   ;;  %v1162_v17 = vld [vmem:[#allocation2 + $0x8] sm:$0xff]  ;;  %v1168_v18 = vld [vmem:[#allocation2] sm:$0xff]  ;;  %s1112_s0 = smov 96   ;;  %s1113_s25 = smov 32   ;;  %vm74_vm1 = vcmask 261120  }
  0x11   :  { %917 = vmatprep.mubr.msk.f32.mxu0 %vm1111_vm0, %v1110_v15  ;;  %910 = vmatpush3.msra.mxu0 %v1152_v14  ;;  %vm832_vm2 = vcmask 261127   ;;  %s1114_s30 = smov [#allocation5]   ;;  %vm840_vm3 = vcmask 7175  }
  0x12   :  { %920 = vmatprep.subr.mxu1 %v1110_v15  ;;  %911 = vmatprep.subr.mxu0 %v1110_v15  ;;  %s848_s4 = sshll.u32 %s1114_s30, 4  ;;  %s849_s4 = int_to_ptr.vmem [resolvable:$true] %s848_s4 }
  0x13   :  { %921 = vmatpush3.msra.mxu1 %v1152_v14  ;;  %912 = vmatpush3.msra.mxu0 %v1155_v16  ;;  %s1081_s5 = scalar_lea.vmem %s849_s4, 16  ;;  %s1085_s6 = scalar_lea.vmem %s849_s4, 32 }
  0x14   :  { %922 = vmatprep.subr.mxu1 %v1110_v15  ;;  %913 = vmatprep.subr.mxu0 %v1110_v15  ;;  %p1082_p5 = scmp.ne.s32.totalorder %s849_s4, %s1081_s5  ;;  %p1086_p6 = scmp.lt.s32.totalorder %s849_s4, %s849_s4 }
  0x15   :  { %923 = vmatpush3.msra.mxu1 %v1155_v16  ;;  %914 = vmatpush3.msra.mxu0 %v1162_v17  ;;  %p1087_p7 = scmp.lt.s32.totalorder %s1085_s6, %s1081_s5 }
  0x16   :  { %924 = vmatprep.subr.mxu1 %v1110_v15  ;;  %915 = vmatprep.subr.mxu0 %v1110_v15 }
  0x17   :  { %916 = vmatpush3.msra.mxu0 %v1168_v18  ;;  %925 = vmatpush3.msra.mxu1 %v1162_v17  ;;  %p1088_p8 = por %p1087_p7, %p1086_p6 }
  0x18   :  { %926 = vmatprep.subr.mxu1 %v1110_v15  ;;  %928 = vmatprep.mubr.msk.f32.mxu1 %vm1111_vm0, %v1110_v15 }
  0x19   :  { %927 = vmatpush3.msra.mxu1 %v1168_v18  ;;  %931 = vmatprep.subr.mxu0 %v1110_v15  ;;  %p1089_p9 = pnand %p1088_p8, %p1082_p5 }
  0x1a   :  { %942 = vmatprep.subr.mxu1 %v1110_v15 }
  0x8b   :  { %v37_v3 = vpop.permute.xlu0 %36 }
  0x8c   :  { %v43_v5 = vmul.f32 %v857_v2, %v37_v3 }
  0x8e   :  { %v1147_v6 = vadd.f32 %v858_v4, %v43_v5 }
  0x90   :  { %997 = vtanh.f32 %v1147_v6  ;;  %v859_v8 = vmul.f32 -1.442695, %v1147_v6 }
  0x92   :  { %999 = vpow2.f32 %v859_v8 }
  0x9d   :  { %v998_v7 = vpop.eup %997 }
  0x9e   :  { %57 = vrot.lane.b32.xlu0 %v998_v7, %s1109_s2 }
  0x9f   :  { %v1000_v9 = vpop.eup %999 }
  0xa0   :  { %v52_v10 = vadd.f32 1.0, %v1000_v9 }
  0xa2   :  { %1001 = vrcp.f32 %v52_v10 }
  0xaf   :  { %v1002_v11 = vpop.eup %1001 }
 0x110   :  { %v58_v12 = vpop.permute.xlu0 %57 }
 0x111   :  { %v60_v13 = vmul.f32 %v1002_v11, %v58_v12 }
 0x113   :  { %1003 = vtanh.f32 %v60_v13  ;;  %v159_v22 = vrot.slane %v60_v13, 7 }
 0x120   :  { %v1004_v19 = vpop.eup %1003 }
 0x121   :  { %63 = vrot.lane.b32.xlu1 %v1004_v19, %s1112_s0 }
 0x193   :  { %v64_v20 = vpop.permute.xlu1 %63 }
 0x194   :  { %v66_v21 = vmul.f32 %v1002_v11, %v64_v20 }
 0x196   :  { %72 = vrot.lane.b32.xlu1 %v66_v21, %s1113_s25 }
 0x19a   :  { %160 = vrot.lane.b32.xlu1 %v159_v22, %s1113_s25 }
 0x208   :  { %v73_v23 = vpop.permute.xlu1 %72 }
 0x209   :  { %918 = vmatmul.mubr.msk.f32.vlgmr.msra.gmra.mxu0 %vm74_vm1, %v73_v23 }
 0x20a   :  { %932 = vmatpush3.msra.mxu0 %v1152_v14  ;;  %939 = vmatprep.mubr.msk.f32.mxu0 %vm1111_vm0, %v1110_v15 }
 0x20b   :  { %933 = vmatprep.subr.mxu0 %v1110_v15 }
 0x20c   :  { %934 = vmatpush3.msra.mxu0 %v1155_v16  ;;  %v161_v35 = vpop.permute.xlu1 %160 }
 0x20d   :  { %935 = vmatprep.subr.mxu0 %v1110_v15 }
 0x20e   :  { %936 = vmatpush3.msra.mxu0 %v1162_v17 }
 0x20f   :  { %937 = vmatprep.subr.mxu0 %v1110_v15 }
 0x210   :  { %938 = vmatpush3.msra.mxu0 %v1168_v18 }
 0x211   :  { %953 = vmatprep.subr.mxu0 %v1110_v15 }
 0x2c9   :  { %v143_v24 = vpop.f32.mrf.mxu0 }
 0x2ca   :  { %v148_v25 = vrot.slane %v143_v24, 7 }
 0x2cb   :  { %v919_v26 = vpop.f32.mrf.mxu0 }
 0x2cc   :  { %v150_v27 = vadd.f32 %v148_v25, %v1147_v6 }
 0x2ce   :  { %1005 = vtanh.f32 %v150_v27  ;;  %v861_v29 = vmul.f32 -1.442695, %v150_v27 }
 0x2d0   :  { %1007 = vpow2.f32 %v861_v29 }
 0x2db   :  { %v1006_v28 = vpop.eup %1005 }
 0x2dc   :  { %165 = vrot.lane.b32.xlu0 %v1006_v28, %s1109_s2 }
 0x2dd   :  { %v1008_v30 = vpop.eup %1007 }
 0x2de   :  { %v154_v31 = vadd.f32 1.0, %v1008_v30 }
 0x2e0   :  { %1009 = vrcp.f32 %v154_v31 }
 0x2ed   :  { %v1010_v32 = vpop.eup %1009 }
 0x2ee   :  { %v163_v36 = vmul.f32 %v1010_v32, %v161_v35 }
 0x34e   :  { %v166_v33 = vpop.permute.xlu0 %165 }
 0x34f   :  { %v168_v34 = vmul.f32 %v1010_v32, %v166_v33 }
 0x351   :  { %170 = vrot.lane.b32.xlu0 %v168_v34, %s1113_s25 }
 0x3c3   :  { %v171_v37 = vpop.permute.xlu0 %170 }
 0x3c4   :  { %v173_v38 = vadd.f32 %v171_v37, %v163_v36 }
 0x3c6   :  { %1011 = vtanh.f32 %v173_v38  ;;  %v268_v55 = vrot.slane %v173_v38, 7 }
 0x3d3   :  { %v1012_v39 = vpop.eup %1011 }
 0x3d4   :  { %176 = vrot.lane.b32.xlu1 %v1012_v39, %s1109_s2 }
 0x446   :  { %v177_v40 = vpop.permute.xlu1 %176 }
 0x447   :  { %v179_v41 = vmul.f32 %v1010_v32, %v177_v40 }
 0x449   :  { %v181_v42 = vrot.slane %v179_v41, 1 }
 0x44b   :  { %182 = vrot.lane.b32.xlu0 %v181_v42, %s1113_s25 }
 0x4bd   :  { %v183_v43 = vpop.permute.xlu0 %182 }
 0x4be   :  { %929 = vmatmul.mubr.msk.f32.vlgmr.msra.gmra.mxu1 %vm74_vm1, %v183_v43 }
 0x4bf   :  { %943 = vmatpush3.msra.mxu1 %v1152_v14  ;;  %950 = vmatprep.mubr.msk.f32.mxu1 %vm1111_vm0, %v1110_v15 }
 0x4c0   :  { %944 = vmatprep.subr.mxu1 %v1110_v15 }
 0x4c1   :  { %945 = vmatpush3.msra.mxu1 %v1155_v16 }
 0x4c2   :  { %946 = vmatprep.subr.mxu1 %v1110_v15 }
 0x4c3   :  { %947 = vmatpush3.msra.mxu1 %v1162_v17 }
 0x4c4   :  { %948 = vmatprep.subr.mxu1 %v1110_v15 }
 0x4c5   :  { %949 = vmatpush3.msra.mxu1 %v1168_v18 }
 0x4c6   :  { %964 = vmatprep.subr.mxu1 %v1110_v15 }
 0x57e   :  { %v252_v44 = vpop.f32.mrf.mxu1 }
 0x57f   :  { %v257_v45 = vrot.slane %v252_v44, 6 }
 0x580   :  { %v930_v46 = vpop.f32.mrf.mxu1 }
 0x581   :  { %v259_v47 = vadd.f32 %v257_v45, %v1147_v6 }
 0x583   :  { %1013 = vtanh.f32 %v259_v47  ;;  %v863_v49 = vmul.f32 -1.442695, %v259_v47 }
 0x585   :  { %1015 = vpow2.f32 %v863_v49 }
 0x590   :  { %v1014_v48 = vpop.eup %1013 }
 0x591   :  { %272 = vrot.lane.b32.xlu1 %v1014_v48, %s1109_s2 }
 0x592   :  { %v1016_v50 = vpop.eup %1015 }
 0x593   :  { %v263_v51 = vadd.f32 1.0, %v1016_v50 }
 0x595   :  { %1017 = vrcp.f32 %v263_v51 }
 0x5a2   :  { %v1018_v52 = vpop.eup %1017 }
 0x5a3   :  { %v270_v56 = vmul.f32 %v1018_v52, %v268_v55 }
 0x603   :  { %v273_v53 = vpop.permute.xlu1 %272 }
 0x604   :  { %v275_v54 = vmul.f32 %v1018_v52, %v273_v53 }
 0x606   :  { %277 = vrot.lane.b32.xlu0 %v275_v54, %s1113_s25 }
 0x678   :  { %v278_v57 = vpop.permute.xlu0 %277 }
 0x679   :  { %v280_v58 = vadd.f32 %v278_v57, %v270_v56 }
 0x67b   :  { %1019 = vtanh.f32 %v280_v58  ;;  %v375_v12 = vrot.slane %v280_v58, 7 }
 0x688   :  { %v1020_v59 = vpop.eup %1019 }
 0x689   :  { %283 = vrot.lane.b32.xlu1 %v1020_v59, %s1109_s2 }
 0x6fb   :  { %v284_v60 = vpop.permute.xlu1 %283 }
 0x6fc   :  { %v286_v61 = vmul.f32 %v1018_v52, %v284_v60 }
 0x6fe   :  { %v288_v62 = vrot.slane %v286_v61, 2 }
 0x700   :  { %289 = vrot.lane.b32.xlu0 %v288_v62, %s1113_s25 }
 0x772   :  { %v290_v63 = vpop.permute.xlu0 %289 }
 0x773   :  { %940 = vmatmul.mubr.msk.f32.vlgmr.msra.gmra.mxu0 %vm74_vm1, %v290_v63 }
 0x774   :  { %954 = vmatpush3.msra.mxu0 %v1152_v14  ;;  %961 = vmatprep.mubr.msk.f32.mxu0 %vm1111_vm0, %v1110_v15 }
 0x775   :  { %955 = vmatprep.subr.mxu0 %v1110_v15 }
 0x776   :  { %956 = vmatpush3.msra.mxu0 %v1155_v16 }
 0x777   :  { %957 = vmatprep.subr.mxu0 %v1110_v15 }
 0x778   :  { %958 = vmatpush3.msra.mxu0 %v1162_v17 }
 0x779   :  { %959 = vmatprep.subr.mxu0 %v1110_v15 }
 0x77a   :  { %960 = vmatpush3.msra.mxu0 %v1168_v18 }
 0x77b   :  { %975 = vmatprep.subr.mxu0 %v1110_v15 }
 0x833   :  { %v359_v0 = vpop.f32.mrf.mxu0 }
 0x834   :  { %v364_v1 = vrot.slane %v359_v0, 5 }
 0x835   :  { %v941_v2 = vpop.f32.mrf.mxu0 }
 0x836   :  { %v366_v3 = vadd.f32 %v364_v1, %v1147_v6 }
 0x838   :  { %1021 = vtanh.f32 %v366_v3  ;;  %v865_v5 = vmul.f32 -1.442695, %v366_v3 }
 0x83a   :  { %1023 = vpow2.f32 %v865_v5 }
 0x845   :  { %v1022_v4 = vpop.eup %1021 }
 0x846   :  { %379 = vrot.lane.b32.xlu1 %v1022_v4, %s1109_s2 }
 0x847   :  { %v1024_v7 = vpop.eup %1023 }
 0x848   :  { %v370_v8 = vadd.f32 1.0, %v1024_v7 }
 0x84a   :  { %1025 = vrcp.f32 %v370_v8 }
 0x857   :  { %v1026_v9 = vpop.eup %1025 }
 0x858   :  { %v377_v13 = vmul.f32 %v1026_v9, %v375_v12 }
 0x8b8   :  { %v380_v10 = vpop.permute.xlu1 %379 }
 0x8b9   :  { %v382_v11 = vmul.f32 %v1026_v9, %v380_v10 }
 0x8bb   :  { %384 = vrot.lane.b32.xlu0 %v382_v11, %s1113_s25 }
 0x92d   :  { %v385_v19 = vpop.permute.xlu0 %384 }
 0x92e   :  { %v387_v20 = vadd.f32 %v385_v19, %v377_v13 }
 0x930   :  { %1027 = vtanh.f32 %v387_v20  ;;  %v482_v37 = vrot.slane %v387_v20, 7 }
 0x93d   :  { %v1028_v21 = vpop.eup %1027 }
 0x93e   :  { %390 = vrot.lane.b32.xlu1 %v1028_v21, %s1109_s2 }
 0x9b0   :  { %v391_v22 = vpop.permute.xlu1 %390 }
 0x9b1   :  { %v393_v23 = vmul.f32 %v1026_v9, %v391_v22 }
 0x9b3   :  { %v395_v24 = vrot.slane %v393_v23, 3 }
 0x9b5   :  { %396 = vrot.lane.b32.xlu0 %v395_v24, %s1113_s25 }
 0xa27   :  { %v397_v25 = vpop.permute.xlu0 %396 }
 0xa28   :  { %951 = vmatmul.mubr.msk.f32.vlgmr.msra.gmra.mxu1 %vm74_vm1, %v397_v25 }
 0xa29   :  { %965 = vmatpush3.msra.mxu1 %v1152_v14  ;;  %972 = vmatprep.mubr.msk.f32.mxu1 %vm1111_vm0, %v1110_v15 }
 0xa2a   :  { %966 = vmatprep.subr.mxu1 %v1110_v15 }
 0xa2b   :  { %967 = vmatpush3.msra.mxu1 %v1155_v16 }
 0xa2c   :  { %968 = vmatprep.subr.mxu1 %v1110_v15 }
 0xa2d   :  { %969 = vmatpush3.msra.mxu1 %v1162_v17 }
 0xa2e   :  { %970 = vmatprep.subr.mxu1 %v1110_v15 }
 0xa2f   :  { %971 = vmatpush3.msra.mxu1 %v1168_v18 }
 0xae8   :  { %v466_v26 = vpop.f32.mrf.mxu1 }
 0xae9   :  { %v471_v27 = vrot.slane %v466_v26, 4 }
 0xaea   :  { %v952_v28 = vpop.f32.mrf.mxu1 }
 0xaeb   :  { %v473_v29 = vadd.f32 %v471_v27, %v1147_v6 }
 0xaed   :  { %1029 = vtanh.f32 %v473_v29  ;;  %v867_v31 = vmul.f32 -1.442695, %v473_v29 }
 0xaef   :  { %1031 = vpow2.f32 %v867_v31 }
 0xafa   :  { %v1030_v30 = vpop.eup %1029 }
 0xafb   :  { %486 = vrot.lane.b32.xlu1 %v1030_v30, %s1109_s2 }
 0xafc   :  { %v1032_v32 = vpop.eup %1031 }
 0xafd   :  { %v477_v33 = vadd.f32 1.0, %v1032_v32 }
 0xaff   :  { %1033 = vrcp.f32 %v477_v33 }
 0xb0c   :  { %v1034_v34 = vpop.eup %1033 }
 0xb0d   :  { %v484_v38 = vmul.f32 %v1034_v34, %v482_v37 }
 0xb6d   :  { %v487_v35 = vpop.permute.xlu1 %486 }
 0xb6e   :  { %v489_v36 = vmul.f32 %v1034_v34, %v487_v35 }
 0xb70   :  { %491 = vrot.lane.b32.xlu0 %v489_v36, %s1113_s25 }
 0xbe2   :  { %v492_v39 = vpop.permute.xlu0 %491 }
 0xbe3   :  { %v494_v40 = vadd.f32 %v492_v39, %v484_v38 }
 0xbe5   :  { %1035 = vtanh.f32 %v494_v40 }
 0xbf2   :  { %v1036_v41 = vpop.eup %1035 }
 0xbf3   :  { %497 = vrot.lane.b32.xlu1 %v1036_v41, %s1109_s2 }
 0xc65   :  { %v498_v42 = vpop.permute.xlu1 %497 }
 0xc66   :  { %v500_v43 = vmul.f32 %v1034_v34, %v498_v42  ;;  %v31_v34 = vld [vmem:[%s1286_s1 + $0x2] sm:$0x1] }
 0xc67   :  { %v823_v35 = vrot.slane %v31_v34, 1 }
 0xc68   :  { %v502_v44 = vrot.slane %v500_v43, 4 }
 0xc6a   :  { %503 = vrot.lane.b32.xlu0 %v502_v44, %s1113_s25 }
 0xcdc   :  { %v504_v45 = vpop.permute.xlu0 %503 }
 0xcdd   :  { %962 = vmatmul.mubr.msk.f32.vlgmr.msra.gmra.mxu0 %vm74_vm1, %v504_v45 }
 0xcde   :  { %976 = vmatpush3.msra.mxu0 %v1152_v14  ;;  %983 = vmatprep.mubr.msk.f32.mxu0 %vm1111_vm0, %v1110_v15 }
 0xcdf   :  { %977 = vmatprep.subr.mxu0 %v1110_v15 }
 0xce0   :  { %978 = vmatpush3.msra.mxu0 %v1155_v16 }
 0xce1   :  { %979 = vmatprep.subr.mxu0 %v1110_v15 }
 0xce2   :  { %980 = vmatpush3.msra.mxu0 %v1162_v17 }
 0xce3   :  { %981 = vmatprep.subr.mxu0 %v1110_v15  ;;  %v589_v15 = vrot.slane %v494_v40, 7 }
 0xce4   :  { %982 = vmatpush3.msra.mxu0 %v1168_v18 }
 0xd9d   :  { %v573_v46 = vpop.f32.mrf.mxu0 }
 0xd9e   :  { %v578_v47 = vrot.slane %v573_v46, 3  ;;  %v32_v46 = vld [vmem:[%s1286_s1 + $0x3] sm:$0x1] }
 0xd9f   :  { %v963_v48 = vpop.f32.mrf.mxu0 }
 0xda0   :  { %v580_v14 = vadd.f32 %v578_v47, %v1147_v6  ;;  %v837_v47 = vrot.slane %v32_v46, 1 }
 0xda2   :  { %1037 = vtanh.f32 %v580_v14  ;;  %v869_v50 = vmul.f32 -1.442695, %v580_v14 }
 0xda4   :  { %1039 = vpow2.f32 %v869_v50 }
 0xdaf   :  { %v1038_v49 = vpop.eup %1037 }
 0xdb0   :  { %593 = vrot.lane.b32.xlu1 %v1038_v49, %s1109_s2 }
 0xdb1   :  { %v1040_v16 = vpop.eup %1039 }
 0xdb2   :  { %v584_v51 = vadd.f32 1.0, %v1040_v16 }
 0xdb4   :  { %1041 = vrcp.f32 %v584_v51 }
 0xdc1   :  { %v1042_v52 = vpop.eup %1041 }
 0xdc2   :  { %v591_v18 = vmul.f32 %v1042_v52, %v589_v15 }
 0xe22   :  { %v594_v17 = vpop.permute.xlu1 %593 }
 0xe23   :  { %v596_v53 = vmul.f32 %v1042_v52, %v594_v17 }
 0xe25   :  { %598 = vrot.lane.b32.xlu0 %v596_v53, %s1113_s25 }
 0xe97   :  { %v599_v54 = vpop.permute.xlu0 %598 }
 0xe98   :  { %v601_v55 = vadd.f32 %v599_v54, %v591_v18 }
 0xe9a   :  { %1043 = vtanh.f32 %v601_v55  ;;  %v696_v9 = vrot.slane %v601_v55, 7 }
 0xea7   :  { %v1044_v56 = vpop.eup %1043 }
 0xea8   :  { %604 = vrot.lane.b32.xlu1 %v1044_v56, %s1109_s2 }
 0xf1a   :  { %v605_v57 = vpop.permute.xlu1 %604 }
 0xf1b   :  { %v607_v58 = vmul.f32 %v1042_v52, %v605_v57 }
 0xf1d   :  { %v609_v59 = vrot.slane %v607_v58, 5 }
 0xf1f   :  { %610 = vrot.lane.b32.xlu0 %v609_v59, %s1113_s25 }
 0xf91   :  { %v611_v60 = vpop.permute.xlu0 %610 }
 0xf92   :  { %973 = vmatmul.mubr.msk.f32.vlgmr.msra.gmra.mxu1 %vm74_vm1, %v611_v60 }
0x1052   :  { %v680_v61 = vpop.f32.mrf.mxu1 }
0x1053   :  { %v685_v62 = vrot.slane %v680_v61, 2 }
0x1054   :  { %v974_v63 = vpop.f32.mrf.mxu1 }
0x1055   :  { %v687_v0 = vadd.f32 %v685_v62, %v1147_v6 }
0x1057   :  { %1045 = vtanh.f32 %v687_v0  ;;  %v871_v2 = vmul.f32 -1.442695, %v687_v0 }
0x1059   :  { %1047 = vpow2.f32 %v871_v2 }
0x1064   :  { %v1046_v1 = vpop.eup %1045 }
0x1065   :  { %700 = vrot.lane.b32.xlu1 %v1046_v1, %s1109_s2 }
0x1066   :  { %v1048_v3 = vpop.eup %1047 }
0x1067   :  { %v691_v4 = vadd.f32 1.0, %v1048_v3 }
0x1069   :  { %1049 = vrcp.f32 %v691_v4 }
0x1076   :  { %v1050_v5 = vpop.eup %1049 }
0x1077   :  { %v698_v10 = vmul.f32 %v1050_v5, %v696_v9 }
0x10d7   :  { %v701_v7 = vpop.permute.xlu1 %700 }
0x10d8   :  { %v703_v8 = vmul.f32 %v1050_v5, %v701_v7 }
0x10da   :  { %705 = vrot.lane.b32.xlu0 %v703_v8, %s1113_s25 }
0x114c   :  { %v706_v11 = vpop.permute.xlu0 %705 }
0x114d   :  { %v708_v12 = vadd.f32 %v706_v11, %v698_v10 }
0x114f   :  { %1051 = vtanh.f32 %v708_v12 }
0x115c   :  { %v1052_v13 = vpop.eup %1051 }
0x115d   :  { %711 = vrot.lane.b32.xlu1 %v1052_v13, %s1109_s2 }
0x11cf   :  { %v712_v19 = vpop.permute.xlu1 %711 }
0x11d0   :  { %v714_v20 = vmul.f32 %v1050_v5, %v712_v19 }
0x11d2   :  { %v716_v21 = vrot.slane %v714_v20, 6 }
0x11d4   :  { %717 = vrot.lane.b32.xlu0 %v716_v21, %s1113_s25 }
0x1246   :  { %v718_v22 = vpop.permute.xlu0 %717 }
0x1247   :  { %984 = vmatmul.mubr.msk.f32.vlgmr.msra.gmra.mxu0 %vm74_vm1, %v718_v22 }
0x1307   :  { %v787_v23 = vpop.f32.mrf.mxu0 }
0x1308   :  { %v792_v24 = vrot.slane %v787_v23, 1 }
0x1309   :  { %v985_v25 = vpop.f32.mrf.mxu0 }
0x130a   :  { %v794_v26 = vadd.f32 %v792_v24, %v1147_v6  ;;  %v803_v6 = vrot.slane %v708_v12, 7 }
0x130c   :  { %1053 = vtanh.f32 %v794_v26  ;;  %v873_v28 = vmul.f32 -1.442695, %v794_v26 }
0x130e   :  { %1055 = vpow2.f32 %v873_v28 }
0x1319   :  { %v1054_v27 = vpop.eup %1053 }
0x131a   :  { %807 = vrot.lane.b32.xlu1 %v1054_v27, %s1109_s2 }
0x131b   :  { %v1056_v29 = vpop.eup %1055 }
0x131c   :  { %v798_v30 = vadd.f32 1.0, %v1056_v29 }
0x131e   :  { %1057 = vrcp.f32 %v798_v30 }
0x132b   :  { %v1058_v31 = vpop.eup %1057 }
0x132c   :  { %v805_v36 = vmul.f32 %v1058_v31, %v803_v6 }
0x138c   :  { %v808_v32 = vpop.permute.xlu1 %807 }
0x138d   :  { %v810_v33 = vmul.f32 %v1058_v31, %v808_v32 }
0x138f   :  { %812 = vrot.lane.b32.xlu0 %v810_v33, %s1113_s25 }
0x1393   :  { %824 = vrot.lane.b32.xlu0 %v823_v35, %s1112_s0 }
0x1401   :  { %v813_v37 = vpop.permute.xlu0 %812 }
0x1402   :  { %v815_v38 = vadd.f32 %v813_v37, %v805_v36 }
0x1404   :  { %1059 = vtanh.f32 %v815_v38 }
0x1405   :  { %v825_v41 = vpop.permute.xlu0 %824 }
0x1411   :  { %v1060_v39 = vpop.eup %1059 }
0x1412   :  { %818 = vrot.lane.b32.xlu1 %v1060_v39, %s1109_s2 }
0x1484   :  { %v819_v40 = vpop.permute.xlu1 %818 }
0x1485   :  { %v821_v42 = vmul.f32 %v1058_v31, %v819_v40 }
0x1487   :  { %v827_v43 = vmul.f32 %v825_v41, %v821_v42 }
0x1489   :  { %829 = vrot.lane.b32.xlu1 %v827_v43, %s1113_s25 }
0x14fb   :  { %v830_v44 = vpop.permute.xlu1 %829 }
0x14fc   :  { %v833_v45 = vsel %vm832_vm2, %v830_v44, 0.0 }
0x14fd   :  { %834 = vadd.xlane.f32.xlu0 %v833_v45 }
0x1586   :  { %v835_v48 = vpop.xlane.xlu0 %834 }
0x1587   :  { %v839_v14 = vadd.f32 %v837_v47, %v835_v48 }
0x1589   :  { %841 = vst.msk [vmem:[#allocation5 - $0x7] sm:$0x80] %vm840_vm3, %v839_v14 }
0x158a   :  { %1092 = shalt.err (!%p1089_p9)
}
0x158b   :  { %851 = dma.vmem_to_hbm [thread:$0]  %s849_s4, 16, %s1288_s3, [#allocation4]  }
0x158c   :  { %1103 = dma.done.wait [#allocation4], 16  }
0x158d   :  { %1104 = vsyncadd [#allocation4], 4294967280 }
0x158e   :  { %855 = vsyncpa [#allocation3], 1 }
0x158f   :  { %856 = vsyncpa [#allocation4], 1 }

</bundles_post_ra>
